<compile_context>
chip_gen: v7x
topology: tpu7x:2x2x1
jax: 0.10.0
libtpu: 0.0.40
codegen_flags: <defaults>
</compile_context>

<pallas_src>
import functools

import jax
import jax.numpy as jnp
from jax.experimental import pallas as pl
from jax.experimental.pallas import tpu as pltpu


def _capsule_kernel(x_ref, out_ref, *, num_iter, inv_r):
    """One batch tile: x_ref is (R, H, TB) with TB on the lane axis."""
    x = x_ref[...].astype(jnp.float32)                       # (R, H, TB)

    def squash(fv):
        # norm over the hidden axis (sublanes); denominator via pl.reciprocal.
        norm = jnp.sum(fv * fv, axis=0, keepdims=True)        # (1, TB)
        sq = jnp.sqrt(norm)
        return fv * (norm * pl.reciprocal((1.0 + sq) * sq, approx=False))

    # Iteration 0: b == 0, so softmax over R is exactly uniform (1/R).
    # Skip the max/exp/normalize pass entirely (bit-identical: 1/R is 2^-3).
    fv = jnp.sum(x, axis=0) * inv_r                           # (H, TB)
    fv = squash(fv)

    b = jnp.zeros_like(x)
    for _ in range(1, num_iter):                              # small static trip count -> unrolled
        # Fused routing-logit update: broadcast of fv folded into the multiply.
        b = b + x * fv[None, :, :]
        m = jnp.max(b, axis=0, keepdims=True)                 # reduce over R (leading axis)
        e = jnp.exp(b - m)                                    # EUP
        c = e * pl.reciprocal(jnp.sum(e, axis=0, keepdims=True), approx=False)
        fv = squash(jnp.sum(c * x, axis=0))                   # (H, TB)

    out_ref[...] = fv.astype(out_ref.dtype)


def capsule_forward(x, num_iter, *, max_tb=2048):
    """x: (B, NUM_ROUTINE, NUM_HIDDEN) float32 -> (B, NUM_HIDDEN) float32."""
    assert num_iter >= 1
    B, R, H = x.shape
    lane = 128

    # Batch tile: multiple of 128 (lane-dense), capped at ~2 MiB f32 input tiles
    # (R=8, H=32 -> 1 KiB per batch row), which fits comfortably in scoped VMEM
    # on v5e/v6e/v7x with double buffering.
    tb = min(max_tb, pl.cdiv(B, lane) * lane)
    b_pad = pl.cdiv(B, tb) * tb

    # Layout plumbing: batch onto the lane axis.
    xt = jnp.transpose(x, (1, 2, 0))                          # (R, H, B)
    if b_pad != B:
        xt = jnp.pad(xt, ((0, 0), (0, 0), (0, b_pad - B)))    # padded lanes produce
                                                              # NaN (0/0 in squash) and are sliced off.

    kernel = functools.partial(_capsule_kernel, num_iter=num_iter, inv_r=1.0 / R)
    out = pl.pallas_call(
        kernel,
        out_shape=jax.ShapeDtypeStruct((H, b_pad), jnp.float32),
        grid=(b_pad // tb,),
        in_specs=[pl.BlockSpec((R, H, tb), lambda i: (0, 0, i))],
        out_specs=pl.BlockSpec((H, tb), lambda i: (0, i)),
        compiler_params=pltpu.CompilerParams(
            # Batch tiles are independent -> shard across v7x's 2 TensorCores.
            dimension_semantics=("parallel",),
            # Above v5e's 16 MiB default, within every chip's physical VMEM.
            vmem_limit_bytes=32 * 1024 * 1024,
        ),
    )(xt)

    return jnp.transpose(out, (1, 0))[:B]                     # (B, H)


def capsule_ref(x, num_iter):
    """Pure-JAX reference mirroring the PyTorch code line-by-line."""
    B, R, H = x.shape
    b = jnp.zeros((B, R, 1), jnp.float32)
    final_matrix = None
    final_vec = None
    for it in range(num_iter):
        if it > 0:
            b = b + x * final_matrix
        c = jax.nn.softmax(b, axis=1)
        final_matrix = c * x
        fv = jnp.sum(final_matrix, axis=1)
        norm = jnp.sum(fv * fv, axis=1, keepdims=True)
        fv = norm * fv / ((1.0 + jnp.sqrt(norm)) * jnp.sqrt(norm))
        final_vec = fv
        final_matrix = jnp.reshape(jnp.tile(fv, (1, R)), (-1, R, H))
    return final_vec


if __name__ == "__main__":
    # opt.NUM_ROUTINE = 8, opt.NUM_HIDDEN = 32, opt.NUM_ITER = 3, batch = 2
    B, NUM_ROUTINE, NUM_HIDDEN, NUM_ITER = 2, 8, 32, 3

    key = jax.random.PRNGKey(0)
    x = jax.random.normal(key, (B, NUM_ROUTINE, NUM_HIDDEN), dtype=jnp.float32)

    out = jax.block_until_ready(capsule_forward(x, NUM_ITER))
    ref = jax.block_until_ready(capsule_ref(x, NUM_ITER))

    assert out.shape == (B, NUM_HIDDEN), out.shape
    assert jnp.allclose(out, ref, atol=1e-5, rtol=1e-5), float(jnp.max(jnp.abs(out - ref)))

    print("KERNEL_OK")
</pallas_src>

<mosaic_0001>
module attributes {stable_mosaic.version = 11 : i64} {
  func.func @_capsule_kernel(%arg0: i32, %arg1: memref<8x32x128xf32, #tpu.memory_space<vmem>>, %arg2: memref<32x128xf32, #tpu.memory_space<vmem>>) attributes {dimension_semantics = [#tpu.dimension_semantics<parallel>], iteration_bounds = array<i64: 1>, scalar_prefetch = 0 : i64, scratch_operands = 0 : i64, tpu.core_type = #tpu.core_type<tc>, window_params = [{transform_indices = @transform_0, window_bounds = array<i64: 8, 32, 128>}, {transform_indices = @transform_1, window_bounds = array<i64: 32, 128>}]} {
    %c0 = arith.constant 0 : index
    %c0_0 = arith.constant 0 : index
    %c0_1 = arith.constant 0 : index
    %0 = vector.load %arg1[%c0, %c0_0, %c0_1] : memref<8x32x128xf32, #tpu.memory_space<vmem>>, vector<8x32x128xf32>
    %cst = arith.constant dense<0.000000e+00> : vector<32x128xf32>
    %1 = vector.multi_reduction <add>, %0, %cst [0] : vector<8x32x128xf32> to vector<32x128xf32>
    %cst_2 = arith.constant 1.250000e-01 : f32
    %2 = vector.broadcast %cst_2 : f32 to vector<32x128xf32>
    %3 = arith.mulf %1, %2 : vector<32x128xf32>
    %4 = arith.mulf %3, %3 : vector<32x128xf32>
    %cst_3 = arith.constant dense<0.000000e+00> : vector<128xf32>
    %5 = vector.multi_reduction <add>, %4, %cst_3 [0] : vector<32x128xf32> to vector<128xf32>
    %6 = vector.shape_cast %5 : vector<128xf32> to vector<1x128xf32>
    %7 = math.sqrt %6 : vector<1x128xf32>
    %cst_4 = arith.constant 1.000000e+00 : f32
    %8 = vector.broadcast %cst_4 : f32 to vector<1x128xf32>
    %9 = arith.addf %8, %7 : vector<1x128xf32>
    %10 = arith.mulf %9, %7 : vector<1x128xf32>
    %11 = tpu.reciprocal %10 : vector<1x128xf32> -> vector<1x128xf32>
    %12 = arith.mulf %6, %11 : vector<1x128xf32>
    %13 = vector.broadcast %12 : vector<1x128xf32> to vector<32x128xf32>
    %14 = arith.mulf %3, %13 : vector<32x128xf32>
    %cst_5 = arith.constant 0.000000e+00 : f32
    %15 = vector.broadcast %cst_5 : f32 to vector<8x32x128xf32>
    %16 = vector.shape_cast %14 : vector<32x128xf32> to vector<1x32x128xf32>
    %17 = vector.broadcast %16 : vector<1x32x128xf32> to vector<8x32x128xf32>
    %18 = arith.mulf %0, %17 : vector<8x32x128xf32>
    %19 = arith.addf %15, %18 : vector<8x32x128xf32>
    %cst_6 = arith.constant dense<0xFF800000> : vector<32x128xf32>
    %20 = vector.multi_reduction <maximumf>, %19, %cst_6 [0] : vector<8x32x128xf32> to vector<32x128xf32>
    %21 = vector.shape_cast %20 : vector<32x128xf32> to vector<1x32x128xf32>
    %22 = vector.broadcast %21 : vector<1x32x128xf32> to vector<8x32x128xf32>
    %23 = arith.subf %19, %22 : vector<8x32x128xf32>
    %24 = math.exp %23 : vector<8x32x128xf32>
    %cst_7 = arith.constant dense<0.000000e+00> : vector<32x128xf32>
    %25 = vector.multi_reduction <add>, %24, %cst_7 [0] : vector<8x32x128xf32> to vector<32x128xf32>
    %26 = vector.shape_cast %25 : vector<32x128xf32> to vector<1x32x128xf32>
    %27 = tpu.reciprocal %26 : vector<1x32x128xf32> -> vector<1x32x128xf32>
    %28 = vector.broadcast %27 : vector<1x32x128xf32> to vector<8x32x128xf32>
    %29 = arith.mulf %24, %28 : vector<8x32x128xf32>
    %30 = arith.mulf %29, %0 : vector<8x32x128xf32>
    %cst_8 = arith.constant dense<0.000000e+00> : vector<32x128xf32>
    %31 = vector.multi_reduction <add>, %30, %cst_8 [0] : vector<8x32x128xf32> to vector<32x128xf32>
    %32 = arith.mulf %31, %31 : vector<32x128xf32>
    %cst_9 = arith.constant dense<0.000000e+00> : vector<128xf32>
    %33 = vector.multi_reduction <add>, %32, %cst_9 [0] : vector<32x128xf32> to vector<128xf32>
    %34 = vector.shape_cast %33 : vector<128xf32> to vector<1x128xf32>
    %35 = math.sqrt %34 : vector<1x128xf32>
    %cst_10 = arith.constant 1.000000e+00 : f32
    %36 = vector.broadcast %cst_10 : f32 to vector<1x128xf32>
    %37 = arith.addf %36, %35 : vector<1x128xf32>
    %38 = arith.mulf %37, %35 : vector<1x128xf32>
    %39 = tpu.reciprocal %38 : vector<1x128xf32> -> vector<1x128xf32>
    %40 = arith.mulf %34, %39 : vector<1x128xf32>
    %41 = vector.broadcast %40 : vector<1x128xf32> to vector<32x128xf32>
    %42 = arith.mulf %31, %41 : vector<32x128xf32>
    %43 = vector.shape_cast %42 : vector<32x128xf32> to vector<1x32x128xf32>
    %44 = vector.broadcast %43 : vector<1x32x128xf32> to vector<8x32x128xf32>
    %45 = arith.mulf %0, %44 : vector<8x32x128xf32>
    %46 = arith.addf %19, %45 : vector<8x32x128xf32>
    %cst_11 = arith.constant dense<0xFF800000> : vector<32x128xf32>
    %47 = vector.multi_reduction <maximumf>, %46, %cst_11 [0] : vector<8x32x128xf32> to vector<32x128xf32>
    %48 = vector.shape_cast %47 : vector<32x128xf32> to vector<1x32x128xf32>
    %49 = vector.broadcast %48 : vector<1x32x128xf32> to vector<8x32x128xf32>
    %50 = arith.subf %46, %49 : vector<8x32x128xf32>
    %51 = math.exp %50 : vector<8x32x128xf32>
    %cst_12 = arith.constant dense<0.000000e+00> : vector<32x128xf32>
    %52 = vector.multi_reduction <add>, %51, %cst_12 [0] : vector<8x32x128xf32> to vector<32x128xf32>
    %53 = vector.shape_cast %52 : vector<32x128xf32> to vector<1x32x128xf32>
    %54 = tpu.reciprocal %53 : vector<1x32x128xf32> -> vector<1x32x128xf32>
    %55 = vector.broadcast %54 : vector<1x32x128xf32> to vector<8x32x128xf32>
    %56 = arith.mulf %51, %55 : vector<8x32x128xf32>
    %57 = arith.mulf %56, %0 : vector<8x32x128xf32>
    %cst_13 = arith.constant dense<0.000000e+00> : vector<32x128xf32>
    %58 = vector.multi_reduction <add>, %57, %cst_13 [0] : vector<8x32x128xf32> to vector<32x128xf32>
    %59 = arith.mulf %58, %58 : vector<32x128xf32>
    %cst_14 = arith.constant dense<0.000000e+00> : vector<128xf32>
    %60 = vector.multi_reduction <add>, %59, %cst_14 [0] : vector<32x128xf32> to vector<128xf32>
    %61 = vector.shape_cast %60 : vector<128xf32> to vector<1x128xf32>
    %62 = math.sqrt %61 : vector<1x128xf32>
    %cst_15 = arith.constant 1.000000e+00 : f32
    %63 = vector.broadcast %cst_15 : f32 to vector<1x128xf32>
    %64 = arith.addf %63, %62 : vector<1x128xf32>
    %65 = arith.mulf %64, %62 : vector<1x128xf32>
    %66 = tpu.reciprocal %65 : vector<1x128xf32> -> vector<1x128xf32>
    %67 = arith.mulf %61, %66 : vector<1x128xf32>
    %68 = vector.broadcast %67 : vector<1x128xf32> to vector<32x128xf32>
    %69 = arith.mulf %58, %68 : vector<32x128xf32>
    %c0_16 = arith.constant 0 : index
    %c0_17 = arith.constant 0 : index
    %70 = vector.load %arg2[%c0_16, %c0_17] : memref<32x128xf32, #tpu.memory_space<vmem>>, vector<32x128xf32>
    tpu.vector_store %arg2[%c0_16, %c0_17], %69 {strides = array<i32>} : memref<32x128xf32, #tpu.memory_space<vmem>>, vector<32x128xf32>,
    return
  }
  func.func @transform_0(%arg0: i32) -> (i32, i32, i32) {
    %c0_i32 = arith.constant 0 : i32
    %c0_i32_0 = arith.constant 0 : i32
    %c0_i32_1 = arith.constant 0 : i32
    return %c0_i32, %c0_i32_0, %arg0 : i32, i32, i32
  }
  func.func @transform_1(%arg0: i32) -> (i32, i32) {
    %c0_i32 = arith.constant 0 : i32
    %c0_i32_0 = arith.constant 0 : i32
    return %c0_i32, %arg0 : i32, i32
  }
}

</mosaic_0001>

<bundles_post_ra>
// kernel: tpu_custom_call.1
= control target key start
LH: loop header
LB: loop body
LE: loop exit
PB: predicated region body
PF: predicated region fallthrough
CT: control target
= control target key end

     0   :  { %6 = vsyncpa [#allocation3], 0  ;;  %s1840_s0 = inlined_call_operand.hbm [shape: f32[8,32,128], index: 0, kind: input, shape index: {}]   ;;  %s1841_s1 = inlined_call_operand.hbm [shape: f32[32,128], index: 1, kind: output, shape index: {}]  }
   0x1   :  { %7 = vsyncpa [#allocation4], 0  ;;  %s1056_s6 = smov [#allocation2]   ;;  %s1008_s10 = scalar_lea.hbm %s1840_s0, 4096 }
   0x2   :  { %s13_s7 = sshll.u32 %s1056_s6, 4  ;;  %p1009_p0 = scmp.ne.s32.totalorder %s1840_s0, %s1008_s10  ;;  %s14_s7 = int_to_ptr.vmem [resolvable:$true] %s13_s7 }
   0x3   :  { %p1012_p1 = scmp.lt.u32.totalorder %s1008_s10, %s1840_s0 }
   0x5   :  { %p1014_p2 = pnand %p1012_p1, %p1009_p0 }
   0x7   :  { %1017 = shalt.err (!%p1014_p2)
}
   0x8   :  { %s1018_s15 = scalar_lea.vmem %s14_s7, 4096  ;;  %p1023_p4 = scmp.lt.s32.totalorder %s14_s7, %s14_s7 }
   0x9   :  { %p1019_p3 = scmp.ne.s32.totalorder %s14_s7, %s1018_s15  ;;  %p1024_p5 = scmp.lt.s32.totalorder %s1018_s15, %s1018_s15 }
   0xb   :  { %p1025_p6 = por %p1024_p5, %p1023_p4 }
   0xd   :  { %p1026_p7 = pnand %p1025_p6, %p1019_p3 }
   0xf   :  { %1029 = shalt.err (!%p1026_p7)
}
  0x10   :  { %s1057_s16 = smov 128   ;;  %s1058_s17 = smov 8  }
  0x11   :  { %19 = dma.hbm_to_vmem [thread:$0]  %s1840_s0, 4096, %s14_s7, [#allocation3], %s1057_s16, %s1057_s16, %s1058_s17  }
  0x12   :  { %1052 = dma.done.wait [#allocation3], 4096  }
  0x13   :  { %1053 = vsyncadd [#allocation3], 4294963200  ;;  %v1085_v0 = vld [vmem:[#allocation2] sm:$0xff]  ;;  %v1087_v1 = vld [vmem:[#allocation2 + $0x8] sm:$0xff]  ;;  %s1059_s0 = smov [#allocation5]  }
  0x14   :  { %v1089_v2 = vld [vmem:[#allocation2 + $0x10] sm:$0xff]  ;;  %v1091_v3 = vld [vmem:[#allocation2 + $0x18] sm:$0xff]  ;;  %v1093_v4 = vld [vmem:[#allocation2 + $0x20] sm:$0xff]  ;;  %s804_s20 = sshll.u32 %s1059_s0, 4  ;;  %s805_s20 = int_to_ptr.vmem [resolvable:$true] %s804_s20 }
  0x15   :  { %v1095_v5 = vld [vmem:[#allocation2 + $0x28] sm:$0xff]  ;;  %v1097_v6 = vld [vmem:[#allocation2 + $0x30] sm:$0xff]  ;;  %v1099_v7 = vld [vmem:[#allocation2 + $0x38] sm:$0xff]  ;;  %v55_v9 = vadd.f32 %v1093_v4, %v1085_v0  ;;  %s1030_s21 = scalar_lea.vmem %s805_s20, 512  ;;  %p1035_p9 = scmp.lt.s32.totalorder %s805_s20, %s805_s20 }
  0x16   :  { %v1101_v8 = vld [vmem:[#allocation2 + $0x40] sm:$0xff]  ;;  %v62_v10 = vadd.f32 %v1095_v5, %v1087_v1  ;;  %v1107_v11 = vld [vmem:[#allocation2 + $0x48] sm:$0xff]  ;;  %v1109_v12 = vld [vmem:[#allocation2 + $0x50] sm:$0xff]  ;;  %v69_v14 = vadd.f32 %v1097_v6, %v1089_v2  ;;  %v76_v15 = vadd.f32 %v1099_v7, %v1091_v3  ;;  %p1031_p8 = scmp.ne.s32.totalorder %s805_s20, %s1030_s21  ;;  %p1036_p10 = scmp.lt.s32.totalorder %s1030_s21, %s1030_s21 }
  0x17   :  { %v1111_v13 = vld [vmem:[#allocation2 + $0x58] sm:$0xff]  ;;  %v1117_v16 = vld [vmem:[#allocation2 + $0x60] sm:$0xff]  ;;  %v1119_v17 = vld [vmem:[#allocation2 + $0x68] sm:$0xff]  ;;  %v56_v19 = vadd.f32 %v55_v9, %v1101_v8 }
  0x18   :  { %1915 = vst [vmem:[#allocation8_spill] sm:$0xff] %v1111_v13  ;;  %1916 = vst [vmem:[#allocation9_spill] sm:$0xff] %v1117_v16  ;;  %v1121_v18 = vld [vmem:[#allocation2 + $0x70] sm:$0xff]  ;;  %v63_v20 = vadd.f32 %v62_v10, %v1107_v11  ;;  %v1125_v21 = vld [vmem:[#allocation2 + $0x78] sm:$0xff]  ;;  %v70_v24 = vadd.f32 %v69_v14, %v1109_v12  ;;  %v77_v25 = vadd.f32 %v76_v15, %v1111_v13  ;;  %p1037_p11 = por %p1036_p10, %p1035_p9 }
  0x19   :  { %1917 = vst [vmem:[#allocation10_spill] sm:$0xff] %v1119_v17  ;;  %1918 = vst [vmem:[#allocation11_spill] sm:$0xff] %v1121_v18  ;;  %v1127_v22 = vld [vmem:[#allocation2 + $0x80] sm:$0xff]  ;;  %v1129_v23 = vld [vmem:[#allocation2 + $0x88] sm:$0xff]  ;;  %v57_v28 = vadd.f32 %v56_v19, %v1117_v16 }
  0x1a   :  { %1919 = vst [vmem:[#allocation12_spill] sm:$0xff] %v1125_v21  ;;  %1920 = vst [vmem:[#allocation13_spill] sm:$0xff] %v1127_v22  ;;  %v1133_v26 = vld [vmem:[#allocation2 + $0x90] sm:$0xff]  ;;  %v1135_v27 = vld [vmem:[#allocation2 + $0x98] sm:$0xff]  ;;  %v64_v29 = vadd.f32 %v63_v20, %v1119_v17  ;;  %v71_v32 = vadd.f32 %v70_v24, %v1121_v18  ;;  %v78_v33 = vadd.f32 %v77_v25, %v1125_v21  ;;  %p1038_p12 = pnand %p1037_p11, %p1031_p8 }
  0x1b   :  { %1921 = vst [vmem:[#allocation14_spill] sm:$0xff] %v1129_v23  ;;  %1922 = vst [vmem:[#allocation15_spill] sm:$0xff] %v1133_v26  ;;  %v1139_v30 = vld [vmem:[#allocation2 + $0xa0] sm:$0xff]  ;;  %v1141_v31 = vld [vmem:[#allocation2 + $0xa8] sm:$0xff]  ;;  %v58_v36 = vadd.f32 %v57_v28, %v1127_v22 }
  0x1c   :  { %1923 = vst [vmem:[#allocation16_spill] sm:$0xff] %v1135_v27  ;;  %1924 = vst [vmem:[#allocation17_spill] sm:$0xff] %v1139_v30  ;;  %v1145_v34 = vld [vmem:[#allocation2 + $0xb0] sm:$0xff]  ;;  %v1147_v35 = vld [vmem:[#allocation2 + $0xb8] sm:$0xff]  ;;  %v65_v37 = vadd.f32 %v64_v29, %v1129_v23  ;;  %v72_v40 = vadd.f32 %v71_v32, %v1133_v26  ;;  %v79_v41 = vadd.f32 %v78_v33, %v1135_v27 }
  0x1d   :  { %1925 = vst [vmem:[#allocation18_spill] sm:$0xff] %v1141_v31  ;;  %1926 = vst [vmem:[#allocation19_spill] sm:$0xff] %v1145_v34  ;;  %v1151_v38 = vld [vmem:[#allocation2 + $0xc0] sm:$0xff]  ;;  %v1153_v39 = vld [vmem:[#allocation2 + $0xc8] sm:$0xff]  ;;  %v59_v44 = vadd.f32 %v58_v36, %v1139_v30 }
  0x1e   :  { %1927 = vst [vmem:[#allocation20_spill] sm:$0xff] %v1147_v35  ;;  %1928 = vst [vmem:[#allocation21_spill] sm:$0xff] %v1151_v38  ;;  %v1157_v42 = vld [vmem:[#allocation2 + $0xd0] sm:$0xff]  ;;  %v1159_v43 = vld [vmem:[#allocation2 + $0xd8] sm:$0xff]  ;;  %v66_v45 = vadd.f32 %v65_v37, %v1141_v31  ;;  %v73_v48 = vadd.f32 %v72_v40, %v1145_v34  ;;  %v80_v49 = vadd.f32 %v79_v41, %v1147_v35 }
  0x1f   :  { %1929 = vst [vmem:[#allocation22_spill] sm:$0xff] %v1153_v39  ;;  %1930 = vst [vmem:[#allocation23_spill] sm:$0xff] %v1157_v42  ;;  %v1163_v46 = vld [vmem:[#allocation2 + $0xe0] sm:$0xff]  ;;  %v1165_v47 = vld [vmem:[#allocation2 + $0xe8] sm:$0xff]  ;;  %v60_v52 = vadd.f32 %v59_v44, %v1151_v38 }
  0x20   :  { %1931 = vst [vmem:[#allocation24_spill] sm:$0xff] %v1159_v43  ;;  %1932 = vst [vmem:[#allocation25_spill] sm:$0xff] %v1163_v46  ;;  %v1169_v50 = vld [vmem:[#allocation2 + $0xf0] sm:$0xff]  ;;  %v1171_v51 = vld [vmem:[#allocation2 + $0xf8] sm:$0xff]  ;;  %v67_v53 = vadd.f32 %v66_v45, %v1153_v39  ;;  %v74_v54 = vadd.f32 %v73_v48, %v1157_v42  ;;  %v81_v55 = vadd.f32 %v80_v49, %v1159_v43 }
  0x21   :  { %1933 = vst [vmem:[#allocation26_spill] sm:$0xff] %v1165_v47  ;;  %1934 = vst [vmem:[#allocation27_spill] sm:$0xff] %v1169_v50  ;;  %v61_v56 = vadd.f32 %v60_v52, %v1163_v46 }
  0x22   :  { %1935 = vst [vmem:[#allocation28_spill] sm:$0xff] %v1171_v51  ;;  %v68_v57 = vadd.f32 %v67_v53, %v1165_v47  ;;  %v75_v58 = vadd.f32 %v74_v54, %v1169_v50  ;;  %v82_v59 = vadd.f32 %v81_v55, %v1171_v51 }
  0x23   :  { %v83_v60 = vmul.f32 0.125, %v61_v56 }
  0x24   :  { %v84_v61 = vmul.f32 0.125, %v68_v57  ;;  %v85_v62 = vmul.f32 0.125, %v75_v58  ;;  %v86_v63 = vmul.f32 0.125, %v82_v59 }
  0x25   :  { %v87_v9 = vmul.f32 %v83_v60, %v83_v60 }
  0x26   :  { %v88_v10 = vmul.f32 %v84_v61, %v84_v61  ;;  %v89_v14 = vmul.f32 %v85_v62, %v85_v62  ;;  %v90_v15 = vmul.f32 %v86_v63, %v86_v63 }
  0x28   :  { %v91_v19 = vadd.f32 %v88_v10, %v87_v9 }
  0x2a   :  { %v92_v20 = vadd.f32 %v91_v19, %v89_v14 }
  0x2c   :  { %v93_v24 = vadd.f32 %v92_v20, %v90_v15 }
  0x2e   :  { %v94_v25 = vrot.slane %v93_v24, 4 }
  0x30   :  { %v95_v28 = vadd.f32 %v94_v25, %v93_v24 }
  0x32   :  { %v96_v29 = vrot.slane %v95_v28, 2 }
  0x34   :  { %v97_v32 = vadd.f32 %v96_v29, %v95_v28 }
  0x36   :  { %v98_v33 = vrot.slane %v97_v32, 1 }
  0x38   :  { %v99_v36 = vadd.f32 %v98_v33, %v97_v32 }
  0x3a   :  { %820 = vrsqrt.f32 %v99_v36  ;;  %vm102_vm0 = vcmp.eq.f32.partialorder %v99_v36, inf  ;;  %v105_v40 = vand.u32 2147483648, %v99_v36  ;;  %vm104_vm1 = vcmp.eq.f32.partialorder %v99_v36, 0.0 }
  0x44   :  { %v821_v37 = vpop.eup %820 }
  0x45   :  { %v101_v41 = vmul.f32 %v821_v37, %v99_v36 }
  0x47   :  { %v103_v44 = vsel %vm102_vm0, %v99_v36, %v101_v41 }
  0x48   :  { %v106_v45 = vsel %vm104_vm1, %v105_v40, %v103_v44 }
  0x49   :  { %v107_v48 = vadd.f32 1.0, %v106_v45 }
  0x4b   :  { %v108_v49 = vmul.f32 %v107_v48, %v106_v45 }
  0x4d   :  { %822 = vrcp.f32 %v108_v49 }
  0x57   :  { %v823_v52 = vpop.eup %822 }
  0x58   :  { %v110_v53 = vmul.f32 %v823_v52, %v99_v36 }
  0x5a   :  { %v111_v54 = vmul.f32 %v110_v53, %v83_v60  ;;  %v112_v55 = vmul.f32 %v110_v53, %v84_v61  ;;  %v113_v56 = vmul.f32 %v110_v53, %v85_v62  ;;  %v114_v57 = vmul.f32 %v110_v53, %v86_v63 }
  0x5c   :  { %v1182_v58 = vmul.f32 %v111_v54, %v1085_v0  ;;  %v1185_v59 = vmul.f32 %v112_v55, %v1087_v1  ;;  %v1188_v9 = vmul.f32 %v113_v56, %v1089_v2  ;;  %v1191_v10 = vmul.f32 %v114_v57, %v1091_v3 }
  0x5d   :  { %v1194_v14 = vmul.f32 %v111_v54, %v1093_v4  ;;  %v1197_v60 = vmul.f32 %v112_v55, %v1095_v5  ;;  %v1200_v61 = vmul.f32 %v113_v56, %v1097_v6  ;;  %v1203_v62 = vmul.f32 %v114_v57, %v1099_v7 }
  0x5e   :  { %1936 = vst [vmem:[#allocation29_spill] sm:$0xff] %v1182_v58  ;;  %1937 = vst [vmem:[#allocation30_spill] sm:$0xff] %v1185_v59  ;;  %v1206_v63 = vmul.f32 %v111_v54, %v1101_v8  ;;  %v1209_v15 = vmul.f32 %v112_v55, %v1107_v11  ;;  %v1212_v19 = vmul.f32 %v113_v56, %v1109_v12 }
  0x5f   :  { %1938 = vst [vmem:[#allocation31_spill] sm:$0xff] %v1188_v9  ;;  %1939 = vst [vmem:[#allocation32_spill] sm:$0xff] %v1191_v10  ;;  %v1215_v20 = vmul.f32 %v114_v57, %v1111_v13  ;;  %v1218_v24 = vmul.f32 %v111_v54, %v1117_v16  ;;  %v1221_v25 = vmul.f32 %v112_v55, %v1119_v17 }
  0x60   :  { %1940 = vst [vmem:[#allocation33_spill] sm:$0xff] %v1194_v14  ;;  %1941 = vst [vmem:[#allocation34_spill] sm:$0xff] %v1197_v60  ;;  %v1224_v28 = vmul.f32 %v113_v56, %v1121_v18  ;;  %v1227_v29 = vmul.f32 %v114_v57, %v1125_v21  ;;  %v179_v32 = vmax.f32 %v1182_v58, %v1194_v14 }
  0x61   :  { %1942 = vst [vmem:[#allocation35_spill] sm:$0xff] %v1200_v61  ;;  %1943 = vst [vmem:[#allocation36_spill] sm:$0xff] %v1203_v62  ;;  %v186_v33 = vmax.f32 %v1185_v59, %v1197_v60  ;;  %v193_v36 = vmax.f32 %v1188_v9, %v1200_v61  ;;  %v200_v37 = vmax.f32 %v1191_v10, %v1203_v62 }
  0x62   :  { %1944 = vst [vmem:[#allocation37_spill] sm:$0xff] %v1206_v63  ;;  %1945 = vst [vmem:[#allocation38_spill] sm:$0xff] %v1209_v15  ;;  %v1238_v40 = vmul.f32 %v111_v54, %v1127_v22  ;;  %v1241_v41 = vmul.f32 %v112_v55, %v1129_v23  ;;  %v1244_v44 = vmul.f32 %v113_v56, %v1133_v26 }
  0x63   :  { %1946 = vst [vmem:[#allocation39_spill] sm:$0xff] %v1212_v19  ;;  %1947 = vst [vmem:[#allocation40_spill] sm:$0xff] %v1215_v20  ;;  %v1247_v45 = vmul.f32 %v114_v57, %v1135_v27  ;;  %v180_v48 = vmax.f32 %v179_v32, %v1206_v63  ;;  %v187_v49 = vmax.f32 %v186_v33, %v1209_v15 }
  0x64   :  { %1948 = vst [vmem:[#allocation41_spill] sm:$0xff] %v1218_v24  ;;  %1949 = vst [vmem:[#allocation42_spill] sm:$0xff] %v1221_v25  ;;  %v194_v52 = vmax.f32 %v193_v36, %v1212_v19  ;;  %v201_v53 = vmax.f32 %v200_v37, %v1215_v20  ;;  %v1254_v22 = vmul.f32 %v111_v54, %v1139_v30 }
  0x65   :  { %1950 = vst [vmem:[#allocation43_spill] sm:$0xff] %v1224_v28  ;;  %1951 = vst [vmem:[#allocation44_spill] sm:$0xff] %v1227_v29  ;;  %v1257_v23 = vmul.f32 %v112_v55, %v1141_v31  ;;  %v1260_v26 = vmul.f32 %v113_v56, %v1145_v34  ;;  %v1263_v27 = vmul.f32 %v114_v57, %v1147_v35 }
  0x66   :  { %1952 = vst [vmem:[#allocation45_spill] sm:$0xff] %v1238_v40  ;;  %1953 = vst [vmem:[#allocation46_spill] sm:$0xff] %v1241_v41  ;;  %v181_v32 = vmax.f32 %v180_v48, %v1218_v24  ;;  %v188_v33 = vmax.f32 %v187_v49, %v1221_v25  ;;  %v195_v36 = vmax.f32 %v194_v52, %v1224_v28 }
  0x67   :  { %1954 = vst [vmem:[#allocation47_spill] sm:$0xff] %v1244_v44  ;;  %1955 = vst [vmem:[#allocation48_spill] sm:$0xff] %v1247_v45  ;;  %v202_v37 = vmax.f32 %v201_v53, %v1227_v29  ;;  %v1270_v30 = vmul.f32 %v111_v54, %v1151_v38  ;;  %v1273_v31 = vmul.f32 %v112_v55, %v1153_v39 }
  0x68   :  { %1956 = vst [vmem:[#allocation49_spill] sm:$0xff] %v1254_v22  ;;  %1957 = vst [vmem:[#allocation50_spill] sm:$0xff] %v1257_v23  ;;  %v1276_v34 = vmul.f32 %v113_v56, %v1157_v42  ;;  %v182_v35 = vmax.f32 %v181_v32, %v1238_v40  ;;  %v189_v21 = vmax.f32 %v188_v33, %v1241_v41 }
  0x69   :  { %1958 = vst [vmem:[#allocation51_spill] sm:$0xff] %v1260_v26  ;;  %1959 = vst [vmem:[#allocation52_spill] sm:$0xff] %v1263_v27  ;;  %v196_v48 = vmax.f32 %v195_v36, %v1244_v44  ;;  %v203_v49 = vmax.f32 %v202_v37, %v1247_v45  ;;  %v1283_v52 = vmul.f32 %v114_v57, %v1159_v43 }
  0x6a   :  { %1960 = vst [vmem:[#allocation53_spill] sm:$0xff] %v1270_v30  ;;  %1961 = vst [vmem:[#allocation54_spill] sm:$0xff] %v1273_v31  ;;  %v183_v53 = vmax.f32 %v182_v35, %v1254_v22  ;;  %v190_v38 = vmax.f32 %v189_v21, %v1257_v23  ;;  %v1290_v18 = vmul.f32 %v111_v54, %v1163_v46 }
  0x6b   :  { %1962 = vst [vmem:[#allocation55_spill] sm:$0xff] %v1276_v34  ;;  %1963 = vst [vmem:[#allocation56_spill] sm:$0xff] %v1283_v52  ;;  %v197_v39 = vmax.f32 %v196_v48, %v1260_v26  ;;  %v204_v42 = vmax.f32 %v203_v49, %v1263_v27  ;;  %v1293_v32 = vmul.f32 %v112_v55, %v1165_v47 }
  0x6c   :  { %1964 = vst [vmem:[#allocation57_spill] sm:$0xff] %v1290_v18  ;;  %v1296_v33 = vmul.f32 %v113_v56, %v1169_v50  ;;  %v184_v36 = vmax.f32 %v183_v53, %v1270_v30  ;;  %v191_v37 = vmax.f32 %v190_v38, %v1273_v31  ;;  %v1302_v21 = vmul.f32 %v114_v57, %v1171_v51 }
  0x6d   :  { %1965 = vst [vmem:[#allocation58_spill] sm:$0xff] %v1293_v32  ;;  %v198_v35 = vmax.f32 %v197_v39, %v1276_v34  ;;  %v205_v48 = vmax.f32 %v204_v42, %v1283_v52 }
  0x6e   :  { %1966 = vst [vmem:[#allocation59_spill] sm:$0xff] %v1296_v33  ;;  %1967 = vst [vmem:[#allocation60_spill] sm:$0xff] %v1302_v21  ;;  %v1306_v54 = vmax.f32 %v184_v36, %v1290_v18  ;;  %v1309_v55 = vmax.f32 %v191_v37, %v1293_v32 }
  0x6f   :  { %v1312_v56 = vmax.f32 %v198_v35, %v1296_v33  ;;  %v1315_v49 = vmax.f32 %v205_v48, %v1302_v21 }
  0x70   :  { %v207_v38 = vsub.f32 %v1182_v58, %v1306_v54  ;;  %v208_v39 = vsub.f32 %v1185_v59, %v1309_v55  ;;  %v211_v53 = vsub.f32 %v1194_v14, %v1306_v54  ;;  %v212_v36 = vsub.f32 %v1197_v60, %v1309_v55 }
  0x71   :  { %v209_v42 = vsub.f32 %v1188_v9, %v1312_v56  ;;  %v210_v57 = vsub.f32 %v1191_v10, %v1315_v49  ;;  %v213_v37 = vsub.f32 %v1200_v61, %v1312_v56  ;;  %v214_v59 = vsub.f32 %v1203_v62, %v1315_v49 }
  0x72   :  { %v239_v35 = vmul.f32 1.442695, %v207_v38  ;;  %v241_v48 = vmul.f32 1.442695, %v208_v39  ;;  %v215_v9 = vsub.f32 %v1206_v63, %v1306_v54  ;;  %v247_v10 = vmul.f32 1.442695, %v211_v53 }
  0x73   :  { %v243_v58 = vmul.f32 1.442695, %v209_v42  ;;  %v245_v51 = vmul.f32 1.442695, %v210_v57  ;;  %v216_v14 = vsub.f32 %v1209_v15, %v1309_v55  ;;  %v249_v60 = vmul.f32 1.442695, %v212_v36 }
  0x74   :  { %824 = vpow2.f32 %v239_v35  ;;  %v217_v61 = vsub.f32 %v1212_v19, %v1312_v56  ;;  %v251_v38 = vmul.f32 1.442695, %v213_v37  ;;  %v218_v39 = vsub.f32 %v1215_v20, %v1315_v49 }
  0x75   :  { %826 = vpow2.f32 %v241_v48  ;;  %v253_v42 = vmul.f32 1.442695, %v214_v59  ;;  %v219_v57 = vsub.f32 %v1218_v24, %v1306_v54  ;;  %v255_v53 = vmul.f32 1.442695, %v215_v9 }
  0x76   :  { %828 = vpow2.f32 %v243_v58  ;;  %v220_v35 = vsub.f32 %v1221_v25, %v1309_v55  ;;  %v257_v36 = vmul.f32 1.442695, %v216_v14  ;;  %v221_v48 = vsub.f32 %v1224_v28, %v1312_v56 }
  0x77   :  { %830 = vpow2.f32 %v245_v51  ;;  %v259_v58 = vmul.f32 1.442695, %v217_v61  ;;  %v222_v37 = vsub.f32 %v1227_v29, %v1315_v49  ;;  %v261_v51 = vmul.f32 1.442695, %v218_v39 }
  0x78   :  { %832 = vpow2.f32 %v247_v10  ;;  %v223_v59 = vsub.f32 %v1238_v40, %v1306_v54  ;;  %v263_v9 = vmul.f32 1.442695, %v219_v57  ;;  %v224_v10 = vsub.f32 %v1241_v41, %v1309_v55 }
  0x79   :  { %834 = vpow2.f32 %v249_v60  ;;  %v265_v14 = vmul.f32 1.442695, %v220_v35  ;;  %v225_v61 = vsub.f32 %v1244_v44, %v1312_v56  ;;  %v226_v39 = vsub.f32 %v1247_v45, %v1315_v49 }
  0x7a   :  { %836 = vpow2.f32 %v251_v38  ;;  %v267_v38 = vmul.f32 1.442695, %v221_v48  ;;  %v271_v35 = vmul.f32 1.442695, %v223_v59  ;;  %v273_v48 = vmul.f32 1.442695, %v224_v10 }
  0x7b   :  { %838 = vpow2.f32 %v253_v42  ;;  %v269_v42 = vmul.f32 1.442695, %v222_v37  ;;  %v275_v37 = vmul.f32 1.442695, %v225_v61  ;;  %v277_v59 = vmul.f32 1.442695, %v226_v39 }
  0x7c   :  { %840 = vpow2.f32 %v255_v53  ;;  %v227_v53 = vsub.f32 %v1254_v22, %v1306_v54  ;;  %v231_v10 = vsub.f32 %v1270_v30, %v1306_v54  ;;  %v233_v30 = vsub.f32 %v1276_v34, %v1312_v56 }
  0x7d   :  { %842 = vpow2.f32 %v257_v36  ;;  %v235_v28 = vsub.f32 %v1290_v18, %v1306_v54  ;;  %v236_v25 = vsub.f32 %v1293_v32, %v1309_v55 }
  0x7e   :  { %v1353_v60 = vpop.eup %824  ;;  %844 = vpow2.f32 %v259_v58  ;;  %v228_v58 = vsub.f32 %v1257_v23, %v1309_v55  ;;  %v291_v54 = vmul.f32 1.442695, %v233_v30 }
  0x7f   :  { %v1357_v29 = vpop.eup %826  ;;  %846 = vpow2.f32 %v261_v51  ;;  %v229_v51 = vsub.f32 %v1260_v26, %v1312_v56  ;;  %v297_v30 = vmul.f32 1.442695, %v236_v25 }
  0x80   :  { %v1361_v57 = vpop.eup %828  ;;  %848 = vpow2.f32 %v263_v9  ;;  %v230_v9 = vsub.f32 %v1263_v27, %v1315_v49  ;;  %v232_v27 = vsub.f32 %v1273_v31, %v1309_v55  ;;  %v281_v39 = vmul.f32 1.442695, %v228_v58 }
  0x81   :  { %v1365_v36 = vpop.eup %830  ;;  %850 = vpow2.f32 %v265_v14  ;;  %v279_v14 = vmul.f32 1.442695, %v227_v53  ;;  %v283_v53 = vmul.f32 1.442695, %v229_v51  ;;  %v234_v31 = vsub.f32 %v1283_v52, %v1315_v49 }
  0x82   :  { %v1369_v44 = vpop.eup %832  ;;  %852 = vpow2.f32 %v267_v38  ;;  %v285_v58 = vmul.f32 1.442695, %v230_v9  ;;  %v289_v52 = vmul.f32 1.442695, %v232_v27 }
  0x83   :  { %v1373_v45 = vpop.eup %834  ;;  %854 = vpow2.f32 %v269_v42  ;;  %v303_v22 = vadd.f32 %v1369_v44, %v1353_v60  ;;  %v293_v55 = vmul.f32 1.442695, %v234_v31 }
  0x84   :  { %v1379_v23 = vpop.eup %836  ;;  %856 = vpow2.f32 %v271_v35  ;;  %v310_v61 = vadd.f32 %v1373_v45, %v1357_v29 }
  0x85   :  { %v1385_v38 = vpop.eup %838  ;;  %858 = vpow2.f32 %v273_v48  ;;  %v317_v42 = vadd.f32 %v1379_v23, %v1361_v57 }
  0x86   :  { %v1391_v26 = vpop.eup %840  ;;  %860 = vpow2.f32 %v275_v37  ;;  %v324_v35 = vadd.f32 %v1385_v38, %v1365_v36  ;;  %v287_v37 = vmul.f32 1.442695, %v231_v10 }
  0x87   :  { %v1397_v41 = vpop.eup %842  ;;  %862 = vpow2.f32 %v277_v59  ;;  %v304_v48 = vadd.f32 %v1391_v26, %v303_v22  ;;  %v237_v22 = vsub.f32 %v1296_v33, %v1312_v56 }
  0x88   :  { %v1402_v40 = vpop.eup %844  ;;  %864 = vpow2.f32 %v279_v14  ;;  %v311_v51 = vadd.f32 %v1397_v41, %v310_v61  ;;  %v238_v61 = vsub.f32 %v1302_v21, %v1315_v49 }
  0x89   :  { %v1407_v34 = vpop.eup %846  ;;  %866 = vpow2.f32 %v281_v39  ;;  %v318_v9 = vadd.f32 %v1402_v40, %v317_v42  ;;  %v295_v42 = vmul.f32 1.442695, %v235_v28  ;;  %v299_v49 = vmul.f32 1.442695, %v237_v22 }
  0x8a   :  { %v1412_v59 = vpop.eup %848  ;;  %868 = vpow2.f32 %v283_v53  ;;  %v325_v10 = vadd.f32 %v1407_v34, %v324_v35 }
  0x8b   :  { %v1417_v14 = vpop.eup %850  ;;  %870 = vpow2.f32 %v285_v58  ;;  %v305_v27 = vadd.f32 %v1412_v59, %v304_v48  ;;  %v301_v48 = vmul.f32 1.442695, %v238_v61 }
  0x8c   :  { %v1422_v39 = vpop.eup %852  ;;  %872 = vpow2.f32 %v287_v37  ;;  %v312_v32 = vadd.f32 %v1417_v14, %v311_v51 }
  0x8d   :  { %v1425_v56 = vpop.eup %854  ;;  %874 = vpow2.f32 %v289_v52  ;;  %v319_v53 = vadd.f32 %v1422_v39, %v318_v9 }
  0x8e   :  { %v1428_v35 = vpop.eup %856  ;;  %876 = vpow2.f32 %v291_v54  ;;  %v326_v31 = vadd.f32 %v1425_v56, %v325_v10 }
  0x8f   :  { %v859_v58 = vpop.eup %858  ;;  %878 = vpow2.f32 %v293_v55  ;;  %v306_v37 = vadd.f32 %v1428_v35, %v305_v27 }
  0x90   :  { %v861_v28 = vpop.eup %860  ;;  %880 = vpow2.f32 %v295_v42  ;;  %v313_v51 = vadd.f32 %v859_v58, %v312_v32 }
  0x91   :  { %v863_v21 = vpop.eup %862  ;;  %882 = vpow2.f32 %v297_v30  ;;  %v320_v52 = vadd.f32 %v861_v28, %v319_v53 }
  0x92   :  { %v865_v25 = vpop.eup %864  ;;  %884 = vpow2.f32 %v299_v49  ;;  %v327_v9 = vadd.f32 %v863_v21, %v326_v31 }
  0x93   :  { %v867_v33 = vpop.eup %866  ;;  %886 = vpow2.f32 %v301_v48  ;;  %v307_v54 = vadd.f32 %v865_v25, %v306_v37 }
  0x94   :  { %v869_v22 = vpop.eup %868  ;;  %v314_v18 = vadd.f32 %v867_v33, %v313_v51 }
  0x95   :  { %v871_v10 = vpop.eup %870  ;;  %v321_v24 = vadd.f32 %v869_v22, %v320_v52 }
  0x96   :  { %v873_v55 = vpop.eup %872  ;;  %v328_v61 = vadd.f32 %v871_v10, %v327_v9 }
  0x97   :  { %v875_v20 = vpop.eup %874  ;;  %v308_v27 = vadd.f32 %v873_v55, %v307_v54 }
  0x98   :  { %v877_v19 = vpop.eup %876  ;;  %v315_v42 = vadd.f32 %v875_v20, %v314_v18 }
  0x99   :  { %v879_v32 = vpop.eup %878  ;;  %v322_v15 = vadd.f32 %v877_v19, %v321_v24 }
  0x9a   :  { %v881_v30 = vpop.eup %880  ;;  %v329_v53 = vadd.f32 %v879_v32, %v328_v61 }
  0x9b   :  { %v883_v63 = vpop.eup %882  ;;  %v309_v49 = vadd.f32 %v881_v30, %v308_v27 }
  0x9c   :  { %v885_v31 = vpop.eup %884  ;;  %v316_v62 = vadd.f32 %v883_v63, %v315_v42 }
  0x9d   :  { %v887_v48 = vpop.eup %886  ;;  %v323_v37 = vadd.f32 %v885_v31, %v322_v15  ;;  %888 = vrcp.f32 %v309_v49 }
  0x9e   :  { %v330_v50 = vadd.f32 %v887_v48, %v329_v53  ;;  %890 = vrcp.f32 %v316_v62 }
  0x9f   :  { %892 = vrcp.f32 %v323_v37 }
  0xa0   :  { %894 = vrcp.f32 %v330_v50 }
  0xa7   :  { %v889_v51 = vpop.eup %888 }
  0xa8   :  { %v891_v52 = vpop.eup %890  ;;  %v335_v18 = vmul.f32 %v889_v51, %v1353_v60  ;;  %v339_v24 = vmul.f32 %v889_v51, %v1369_v44  ;;  %v343_v61 = vmul.f32 %v889_v51, %v1391_v26  ;;  %v347_v27 = vmul.f32 %v889_v51, %v1412_v59 }
  0xa9   :  { %v893_v9 = vpop.eup %892  ;;  %v336_v42 = vmul.f32 %v891_v52, %v1357_v29  ;;  %v340_v15 = vmul.f32 %v891_v52, %v1373_v45  ;;  %v344_v62 = vmul.f32 %v891_v52, %v1397_v41  ;;  %v348_v50 = vmul.f32 %v891_v52, %v1417_v14 }
  0xaa   :  { %v895_v54 = vpop.eup %894  ;;  %v337_v53 = vmul.f32 %v893_v9, %v1361_v57  ;;  %v341_v49 = vmul.f32 %v893_v9, %v1379_v23  ;;  %v345_v60 = vmul.f32 %v893_v9, %v1402_v40  ;;  %v349_v44 = vmul.f32 %v893_v9, %v1422_v39 }
  0xab   :  { %v338_v26 = vmul.f32 %v895_v54, %v1365_v36  ;;  %v342_v59 = vmul.f32 %v895_v54, %v1385_v38  ;;  %v346_v29 = vmul.f32 %v895_v54, %v1407_v34  ;;  %v350_v45 = vmul.f32 %v895_v54, %v1425_v56 }
  0xac   :  { %v351_v41 = vmul.f32 %v889_v51, %v1428_v35  ;;  %v352_v37 = vmul.f32 %v891_v52, %v859_v58  ;;  %v353_v14 = vmul.f32 %v893_v9, %v861_v28  ;;  %v354_v47 = vmul.f32 %v895_v54, %v863_v21 }
  0xad   :  { %v355_v57 = vmul.f32 %v889_v51, %v865_v25  ;;  %v356_v46 = vmul.f32 %v891_v52, %v867_v33  ;;  %v357_v23 = vmul.f32 %v893_v9, %v869_v22  ;;  %v358_v43 = vmul.f32 %v895_v54, %v871_v10 }
  0xae   :  { %v359_v40 = vmul.f32 %v889_v51, %v873_v55  ;;  %v360_v17 = vmul.f32 %v891_v52, %v875_v20  ;;  %v361_v39 = vmul.f32 %v893_v9, %v877_v19  ;;  %v362_v16 = vmul.f32 %v895_v54, %v879_v32 }
  0xaf   :  { %v367_v36 = vmul.f32 %v335_v18, %v1085_v0  ;;  %v368_v38 = vmul.f32 %v336_v42, %v1087_v1  ;;  %v369_v34 = vmul.f32 %v337_v53, %v1089_v2  ;;  %v370_v56 = vmul.f32 %v338_v26, %v1091_v3  ;;  %v1968_v18 = vld [vmem:[#allocation9_spill] sm:$0xff]  ;;  %v1969_v42 = vld [vmem:[#allocation10_spill] sm:$0xff]  ;;  %v1970_v53 = vld [vmem:[#allocation11_spill] sm:$0xff] }
  0xb0   :  { %v371_v35 = vmul.f32 %v339_v24, %v1093_v4  ;;  %v372_v21 = vmul.f32 %v340_v15, %v1095_v5  ;;  %v373_v33 = vmul.f32 %v341_v49, %v1097_v6  ;;  %v374_v58 = vmul.f32 %v342_v59, %v1099_v7  ;;  %v1971_v26 = vld [vmem:[#allocation12_spill] sm:$0xff] }
  0xb1   :  { %v363_v28 = vmul.f32 %v889_v51, %v881_v30  ;;  %v364_v20 = vmul.f32 %v891_v52, %v883_v63  ;;  %v365_v19 = vmul.f32 %v893_v9, %v885_v31  ;;  %v366_v25 = vmul.f32 %v895_v54, %v887_v48  ;;  %v1972_v51 = vld [vmem:[#allocation13_spill] sm:$0xff]  ;;  %v1973_v9 = vld [vmem:[#allocation14_spill] sm:$0xff] }
  0xb2   :  { %v375_v22 = vmul.f32 %v343_v61, %v1101_v8  ;;  %v376_v10 = vmul.f32 %v344_v62, %v1107_v11  ;;  %v377_v55 = vmul.f32 %v345_v60, %v1109_v12  ;;  %v378_v32 = vmul.f32 %v346_v29, %v1111_v13  ;;  %v1974_v61 = vld [vmem:[#allocation15_spill] sm:$0xff]  ;;  %v1975_v60 = vld [vmem:[#allocation16_spill] sm:$0xff] }
  0xb3   :  { %v379_v24 = vmul.f32 %v347_v27, %v1968_v18  ;;  %v380_v15 = vmul.f32 %v348_v50, %v1969_v42  ;;  %v381_v49 = vmul.f32 %v349_v44, %v1970_v53  ;;  %v382_v59 = vmul.f32 %v350_v45, %v1971_v26  ;;  %v1976_v42 = vld [vmem:[#allocation17_spill] sm:$0xff]  ;;  %v1977_v53 = vld [vmem:[#allocation18_spill] sm:$0xff] }
  0xb4   :  { %v399_v30 = vadd.f32 %v371_v35, %v367_v36  ;;  %v406_v63 = vadd.f32 %v372_v21, %v368_v38  ;;  %v413_v31 = vadd.f32 %v373_v33, %v369_v34  ;;  %v420_v48 = vadd.f32 %v374_v58, %v370_v56  ;;  %v1978_v36 = vld [vmem:[#allocation19_spill] sm:$0xff]  ;;  %v1979_v34 = vld [vmem:[#allocation20_spill] sm:$0xff]  ;;  %v1980_v33 = vld [vmem:[#allocation21_spill] sm:$0xff] }
  0xb5   :  { %v383_v52 = vmul.f32 %v351_v41, %v1972_v51  ;;  %v384_v54 = vmul.f32 %v352_v37, %v1973_v9  ;;  %v385_v62 = vmul.f32 %v353_v14, %v1974_v61  ;;  %v386_v29 = vmul.f32 %v354_v47, %v1975_v60  ;;  %v1981_v58 = vld [vmem:[#allocation22_spill] sm:$0xff] }
  0xb6   :  { %v400_v13 = vadd.f32 %v399_v30, %v375_v22  ;;  %v407_v27 = vadd.f32 %v406_v63, %v376_v10  ;;  %v414_v18 = vadd.f32 %v413_v31, %v377_v55  ;;  %v421_v50 = vadd.f32 %v420_v48, %v378_v32  ;;  %v1982_v22 = vld [vmem:[#allocation23_spill] sm:$0xff]  ;;  %v1983_v55 = vld [vmem:[#allocation24_spill] sm:$0xff]  ;;  %v1984_v31 = vld [vmem:[#allocation25_spill] sm:$0xff] }
  0xb7   :  { %v387_v44 = vmul.f32 %v355_v57, %v1976_v42  ;;  %v388_v45 = vmul.f32 %v356_v46, %v1977_v53  ;;  %v389_v38 = vmul.f32 %v357_v23, %v1978_v36  ;;  %v390_v56 = vmul.f32 %v358_v43, %v1979_v34  ;;  %v1985_v48 = vld [vmem:[#allocation26_spill] sm:$0xff] }
  0xb8   :  { %v401_v35 = vadd.f32 %v400_v13, %v379_v24  ;;  %v408_v41 = vadd.f32 %v407_v27, %v380_v15  ;;  %v415_v21 = vadd.f32 %v414_v18, %v381_v49  ;;  %v422_v37 = vadd.f32 %v421_v50, %v382_v59  ;;  %v1986_v13 = vld [vmem:[#allocation27_spill] sm:$0xff]  ;;  %v1987_v18 = vld [vmem:[#allocation28_spill] sm:$0xff] }
  0xb9   :  { %v391_v14 = vmul.f32 %v359_v40, %v1980_v33  ;;  %v392_v47 = vmul.f32 %v360_v17, %v1981_v58  ;;  %v393_v10 = vmul.f32 %v361_v39, %v1982_v22  ;;  %v394_v32 = vmul.f32 %v362_v16, %v1983_v55 }
  0xba   :  { %v402_v30 = vadd.f32 %v401_v35, %v383_v52  ;;  %v409_v57 = vadd.f32 %v408_v41, %v384_v54  ;;  %v416_v63 = vadd.f32 %v415_v21, %v385_v62  ;;  %v423_v46 = vadd.f32 %v422_v37, %v386_v29 }
  0xbb   :  { %v395_v23 = vmul.f32 %v363_v28, %v1984_v31  ;;  %v396_v43 = vmul.f32 %v364_v20, %v1985_v48  ;;  %v397_v24 = vmul.f32 %v365_v19, %v1986_v13  ;;  %v398_v15 = vmul.f32 %v366_v25, %v1987_v18 }
  0xbc   :  { %v403_v49 = vadd.f32 %v402_v30, %v387_v44  ;;  %v410_v40 = vadd.f32 %v409_v57, %v388_v45  ;;  %v417_v59 = vadd.f32 %v416_v63, %v389_v38  ;;  %v424_v17 = vadd.f32 %v423_v46, %v390_v56 }
  0xbe   :  { %v404_v27 = vadd.f32 %v403_v49, %v391_v14  ;;  %v411_v39 = vadd.f32 %v410_v40, %v392_v47  ;;  %v418_v50 = vadd.f32 %v417_v59, %v393_v10  ;;  %v425_v16 = vadd.f32 %v424_v17, %v394_v32 }
  0xc0   :  { %v405_v52 = vadd.f32 %v404_v27, %v395_v23  ;;  %v412_v54 = vadd.f32 %v411_v39, %v396_v43  ;;  %v419_v62 = vadd.f32 %v418_v50, %v397_v24  ;;  %v426_v29 = vadd.f32 %v425_v16, %v398_v15 }
  0xc2   :  { %v427_v35 = vmul.f32 %v405_v52, %v405_v52  ;;  %v428_v28 = vmul.f32 %v412_v54, %v412_v54  ;;  %v429_v41 = vmul.f32 %v419_v62, %v419_v62  ;;  %v430_v20 = vmul.f32 %v426_v29, %v426_v29 }
  0xc4   :  { %v431_v21 = vadd.f32 %v428_v28, %v427_v35  ;;  %v1990_v35 = vld [vmem:[#allocation10_spill] sm:$0xff]  ;;  %v1991_v28 = vld [vmem:[#allocation11_spill] sm:$0xff] }
  0xc6   :  { %v432_v19 = vadd.f32 %v431_v21, %v429_v41 }
  0xc8   :  { %v433_v37 = vadd.f32 %v432_v19, %v430_v20 }
  0xca   :  { %v434_v25 = vrot.slane %v433_v37, 4 }
  0xcc   :  { %v435_v44 = vadd.f32 %v434_v25, %v433_v37  ;;  %v1992_v37 = vld [vmem:[#allocation29_spill] sm:$0xff] }
  0xce   :  { %v436_v45 = vrot.slane %v435_v44, 2 }
  0xd0   :  { %v437_v38 = vadd.f32 %v436_v45, %v435_v44 }
  0xd2   :  { %v438_v56 = vrot.slane %v437_v38, 1 }
  0xd4   :  { %v439_v14 = vadd.f32 %v438_v56, %v437_v38 }
  0xd6   :  { %896 = vrsqrt.f32 %v439_v14  ;;  %vm442_vm2 = vcmp.eq.f32.partialorder %v439_v14, inf  ;;  %v445_v10 = vand.u32 2147483648, %v439_v14  ;;  %vm444_vm3 = vcmp.eq.f32.partialorder %v439_v14, 0.0 }
  0xe0   :  { %v897_v47 = vpop.eup %896 }
  0xe1   :  { %v441_v32 = vmul.f32 %v897_v47, %v439_v14 }
  0xe3   :  { %v443_v30 = vsel %vm442_vm2, %v439_v14, %v441_v32 }
  0xe4   :  { %v446_v57 = vsel %vm444_vm3, %v445_v10, %v443_v30 }
  0xe5   :  { %v447_v63 = vadd.f32 1.0, %v446_v57 }
  0xe7   :  { %v448_v46 = vmul.f32 %v447_v63, %v446_v57  ;;  %v2000_v63 = vld [vmem:[#allocation37_spill] sm:$0xff] }
  0xe9   :  { %898 = vrcp.f32 %v448_v46 }
  0xf3   :  { %v899_v23 = vpop.eup %898 }
  0xf4   :  { %v450_v43 = vmul.f32 %v899_v23, %v439_v14  ;;  %v1999_v14 = vld [vmem:[#allocation36_spill] sm:$0xff]  ;;  %v2001_v23 = vld [vmem:[#allocation38_spill] sm:$0xff] }
  0xf6   :  { %v451_v24 = vmul.f32 %v450_v43, %v405_v52  ;;  %v452_v15 = vmul.f32 %v450_v43, %v412_v54  ;;  %v1481_v49 = vmul.f32 %v450_v43, %v419_v62  ;;  %v1483_v40 = vmul.f32 %v450_v43, %v426_v29  ;;  %v1988_v62 = vld [vmem:[#allocation8_spill] sm:$0xff]  ;;  %v1989_v29 = vld [vmem:[#allocation9_spill] sm:$0xff] }
  0xf8   :  { %v455_v59 = vmul.f32 %v451_v24, %v1085_v0  ;;  %v456_v17 = vmul.f32 %v452_v15, %v1087_v1  ;;  %v457_v27 = vmul.f32 %v1481_v49, %v1089_v2  ;;  %v458_v39 = vmul.f32 %v1483_v40, %v1091_v3 }
  0xf9   :  { %v459_v50 = vmul.f32 %v451_v24, %v1093_v4  ;;  %v460_v16 = vmul.f32 %v452_v15, %v1095_v5  ;;  %v461_v52 = vmul.f32 %v1481_v49, %v1097_v6  ;;  %v462_v54 = vmul.f32 %v1483_v40, %v1099_v7 }
  0xfa   :  { %v463_v0 = vmul.f32 %v451_v24, %v1101_v8  ;;  %v464_v1 = vmul.f32 %v452_v15, %v1107_v11  ;;  %v465_v2 = vmul.f32 %v1481_v49, %v1109_v12  ;;  %v466_v3 = vmul.f32 %v1483_v40, %v1988_v62 }
  0xfb   :  { %v467_v4 = vmul.f32 %v451_v24, %v1989_v29  ;;  %v468_v5 = vmul.f32 %v452_v15, %v1990_v35  ;;  %v469_v6 = vmul.f32 %v1481_v49, %v1991_v28  ;;  %v470_v7 = vmul.f32 %v1483_v40, %v1971_v26 }
  0xfc   :  { %v471_v8 = vmul.f32 %v451_v24, %v1972_v51  ;;  %v472_v11 = vmul.f32 %v452_v15, %v1973_v9  ;;  %v473_v12 = vmul.f32 %v1481_v49, %v1974_v61  ;;  %v474_v41 = vmul.f32 %v1483_v40, %v1975_v60  ;;  %v1993_v61 = vld [vmem:[#allocation30_spill] sm:$0xff]  ;;  %v1994_v60 = vld [vmem:[#allocation31_spill] sm:$0xff] }
  0xfd   :  { %v475_v20 = vmul.f32 %v451_v24, %v1976_v42  ;;  %v476_v21 = vmul.f32 %v452_v15, %v1977_v53  ;;  %v477_v19 = vmul.f32 %v1481_v49, %v1978_v36  ;;  %v478_v26 = vmul.f32 %v1483_v40, %v1979_v34  ;;  %v1995_v53 = vld [vmem:[#allocation32_spill] sm:$0xff]  ;;  %v1996_v36 = vld [vmem:[#allocation33_spill] sm:$0xff]  ;;  %v1997_v34 = vld [vmem:[#allocation34_spill] sm:$0xff] }
  0xfe   :  { %v479_v51 = vmul.f32 %v451_v24, %v1980_v33  ;;  %v480_v9 = vmul.f32 %v452_v15, %v1981_v58  ;;  %v1524_v25 = vadd.f32 %v455_v59, %v1992_v37  ;;  %v1527_v44 = vadd.f32 %v456_v17, %v1993_v61  ;;  %v1998_v33 = vld [vmem:[#allocation35_spill] sm:$0xff] }
  0xff   :  { %v1530_v42 = vadd.f32 %v457_v27, %v1994_v60  ;;  %v1533_v45 = vadd.f32 %v458_v39, %v1995_v53  ;;  %v1536_v38 = vadd.f32 %v459_v50, %v1996_v36  ;;  %v1539_v56 = vadd.f32 %v460_v16, %v1997_v34  ;;  %v2002_v59 = vld [vmem:[#allocation39_spill] sm:$0xff]  ;;  %v2003_v27 = vld [vmem:[#allocation40_spill] sm:$0xff]  ;;  %v2012_v60 = vld [vmem:[#allocation49_spill] sm:$0xff] }
 0x100   :  { %v1542_v58 = vadd.f32 %v461_v52, %v1998_v33  ;;  %v1545_v47 = vadd.f32 %v462_v54, %v1999_v14  ;;  %v481_v10 = vmul.f32 %v1481_v49, %v1982_v22  ;;  %v482_v32 = vmul.f32 %v1483_v40, %v1983_v55  ;;  %v2004_v22 = vld [vmem:[#allocation41_spill] sm:$0xff]  ;;  %v2005_v55 = vld [vmem:[#allocation42_spill] sm:$0xff]  ;;  %v2014_v36 = vld [vmem:[#allocation51_spill] sm:$0xff] }
 0x101   :  { %v483_v30 = vmul.f32 %v451_v24, %v1984_v31  ;;  %v484_v57 = vmul.f32 %v452_v15, %v1985_v48  ;;  %v1554_v46 = vadd.f32 %v463_v0, %v2000_v63  ;;  %v1557_v43 = vadd.f32 %v464_v1, %v2001_v23  ;;  %v2006_v31 = vld [vmem:[#allocation43_spill] sm:$0xff]  ;;  %v2007_v24 = vld [vmem:[#allocation44_spill] sm:$0xff]  ;;  %v2013_v53 = vld [vmem:[#allocation50_spill] sm:$0xff] }
 0x102   :  { %v1560_v17 = vadd.f32 %v465_v2, %v2002_v59  ;;  %v1563_v39 = vadd.f32 %v466_v3, %v2003_v27  ;;  %v1566_v50 = vadd.f32 %v467_v4, %v2004_v22  ;;  %v1569_v16 = vadd.f32 %v468_v5, %v2005_v55  ;;  %v2008_v2 = vld [vmem:[#allocation45_spill] sm:$0xff]  ;;  %v2009_v3 = vld [vmem:[#allocation46_spill] sm:$0xff]  ;;  %v2010_v4 = vld [vmem:[#allocation47_spill] sm:$0xff] }
 0x103   :  { %v1572_v48 = vadd.f32 %v469_v6, %v2006_v31  ;;  %v1575_v15 = vadd.f32 %v470_v7, %v2007_v24  ;;  %v519_v52 = vmax.f32 %v1524_v25, %v1536_v38  ;;  %v526_v54 = vmax.f32 %v1527_v44, %v1539_v56  ;;  %v2011_v5 = vld [vmem:[#allocation48_spill] sm:$0xff]  ;;  %v2016_v59 = vld [vmem:[#allocation53_spill] sm:$0xff]  ;;  %v2017_v27 = vld [vmem:[#allocation54_spill] sm:$0xff] }
 0x104   :  { %v533_v0 = vmax.f32 %v1530_v42, %v1542_v58  ;;  %v540_v1 = vmax.f32 %v1533_v45, %v1545_v47  ;;  %v1586_v62 = vadd.f32 %v471_v8, %v2008_v2  ;;  %v1589_v29 = vadd.f32 %v472_v11, %v2009_v3  ;;  %v2015_v34 = vld [vmem:[#allocation52_spill] sm:$0xff]  ;;  %v2018_v22 = vld [vmem:[#allocation55_spill] sm:$0xff]  ;;  %v2021_v3 = vld [vmem:[#allocation58_spill] sm:$0xff] }
 0x105   :  { %v1592_v35 = vadd.f32 %v473_v12, %v2010_v4  ;;  %v1595_v28 = vadd.f32 %v474_v41, %v2011_v5  ;;  %v520_v6 = vmax.f32 %v519_v52, %v1554_v46  ;;  %v527_v7 = vmax.f32 %v526_v54, %v1557_v43  ;;  %v2022_v5 = vld [vmem:[#allocation59_spill] sm:$0xff] }
 0x106   :  { %v534_v37 = vmax.f32 %v533_v0, %v1560_v17  ;;  %v541_v61 = vmax.f32 %v540_v1, %v1563_v39  ;;  %v1602_v8 = vadd.f32 %v475_v20, %v2012_v60  ;;  %v1605_v11 = vadd.f32 %v476_v21, %v2013_v53  ;;  %v2020_v1 = vld [vmem:[#allocation57_spill] sm:$0xff] }
 0x107   :  { %v1608_v12 = vadd.f32 %v477_v19, %v2014_v36  ;;  %v1611_v41 = vadd.f32 %v478_v26, %v2015_v34  ;;  %v521_v33 = vmax.f32 %v520_v6, %v1566_v50  ;;  %v528_v14 = vmax.f32 %v527_v7, %v1569_v16  ;;  %v2023_v7 = vld [vmem:[#allocation60_spill] sm:$0xff] }
 0x108   :  { %v535_v63 = vmax.f32 %v534_v37, %v1572_v48  ;;  %v542_v23 = vmax.f32 %v541_v61, %v1575_v15  ;;  %v485_v20 = vmul.f32 %v1481_v49, %v1986_v13  ;;  %v1620_v21 = vadd.f32 %v479_v51, %v2016_v59  ;;  %v2019_v49 = vld [vmem:[#allocation56_spill] sm:$0xff] }
 0x109   :  { %v1623_v19 = vadd.f32 %v480_v9, %v2017_v27  ;;  %v1626_v26 = vadd.f32 %v481_v10, %v2018_v22  ;;  %v522_v55 = vmax.f32 %v521_v33, %v1586_v62  ;;  %v529_v31 = vmax.f32 %v528_v14, %v1589_v29 }
 0x10a   :  { %v536_v24 = vmax.f32 %v535_v63, %v1592_v35  ;;  %v543_v52 = vmax.f32 %v542_v23, %v1595_v28  ;;  %v486_v13 = vmul.f32 %v1483_v40, %v1987_v18  ;;  %v1635_v51 = vadd.f32 %v482_v32, %v2019_v49 }
 0x10b   :  { %v523_v9 = vmax.f32 %v522_v55, %v1602_v8  ;;  %v530_v54 = vmax.f32 %v529_v31, %v1605_v11  ;;  %v1642_v2 = vadd.f32 %v483_v30, %v2020_v1  ;;  %v1645_v4 = vadd.f32 %v484_v57, %v2021_v3 }
 0x10c   :  { %v537_v10 = vmax.f32 %v536_v24, %v1608_v12  ;;  %v544_v0 = vmax.f32 %v543_v52, %v1611_v41  ;;  %v1648_v6 = vadd.f32 %v485_v20, %v2022_v5  ;;  %v1654_v37 = vadd.f32 %v486_v13, %v2023_v7 }
 0x10d   :  { %v524_v18 = vmax.f32 %v523_v9, %v1620_v21  ;;  %v531_v40 = vmax.f32 %v530_v54, %v1623_v19 }
 0x10e   :  { %v538_v32 = vmax.f32 %v537_v10, %v1626_v26  ;;  %v545_v61 = vmax.f32 %v544_v0, %v1635_v51 }
 0x10f   :  { %v1658_v30 = vmax.f32 %v524_v18, %v1642_v2  ;;  %v1661_v57 = vmax.f32 %v531_v40, %v1645_v4 }
 0x110   :  { %v1664_v60 = vmax.f32 %v538_v32, %v1648_v6  ;;  %v1667_v53 = vmax.f32 %v545_v61, %v1654_v37 }
 0x111   :  { %v547_v36 = vsub.f32 %v1524_v25, %v1658_v30  ;;  %v548_v34 = vsub.f32 %v1527_v44, %v1661_v57  ;;  %v551_v63 = vsub.f32 %v1536_v38, %v1658_v30  ;;  %v552_v23 = vsub.f32 %v1539_v56, %v1661_v57 }
 0x112   :  { %v549_v33 = vsub.f32 %v1530_v42, %v1664_v60  ;;  %v550_v14 = vsub.f32 %v1533_v45, %v1667_v53  ;;  %v553_v20 = vsub.f32 %v1542_v58, %v1664_v60  ;;  %v554_v44 = vsub.f32 %v1545_v47, %v1667_v53 }
 0x113   :  { %v579_v59 = vmul.f32 1.442695, %v547_v36  ;;  %v581_v25 = vmul.f32 1.442695, %v548_v34  ;;  %v555_v42 = vsub.f32 %v1554_v46, %v1658_v30  ;;  %v587_v45 = vmul.f32 1.442695, %v551_v63 }
 0x114   :  { %v583_v27 = vmul.f32 1.442695, %v549_v33  ;;  %v585_v22 = vmul.f32 1.442695, %v550_v14  ;;  %v556_v38 = vsub.f32 %v1557_v43, %v1661_v57  ;;  %v589_v56 = vmul.f32 1.442695, %v552_v23 }
 0x115   :  { %900 = vpow2.f32 %v579_v59  ;;  %v557_v58 = vsub.f32 %v1560_v17, %v1664_v60  ;;  %v591_v55 = vmul.f32 1.442695, %v553_v20  ;;  %v558_v31 = vsub.f32 %v1563_v39, %v1667_v53 }
 0x116   :  { %902 = vpow2.f32 %v581_v25  ;;  %v593_v47 = vmul.f32 1.442695, %v554_v44  ;;  %v559_v46 = vsub.f32 %v1566_v50, %v1658_v30  ;;  %v595_v24 = vmul.f32 1.442695, %v555_v42 }
 0x117   :  { %904 = vpow2.f32 %v583_v27  ;;  %v560_v43 = vsub.f32 %v1569_v16, %v1661_v57  ;;  %v597_v52 = vmul.f32 1.442695, %v556_v38  ;;  %v561_v17 = vsub.f32 %v1572_v48, %v1664_v60 }
 0x118   :  { %906 = vpow2.f32 %v585_v22  ;;  %v599_v13 = vmul.f32 1.442695, %v557_v58  ;;  %v562_v39 = vsub.f32 %v1575_v15, %v1667_v53  ;;  %v601_v49 = vmul.f32 1.442695, %v558_v31 }
 0x119   :  { %908 = vpow2.f32 %v587_v45  ;;  %v563_v50 = vsub.f32 %v1586_v62, %v1658_v30  ;;  %v603_v9 = vmul.f32 1.442695, %v559_v46  ;;  %v564_v16 = vsub.f32 %v1589_v29, %v1661_v57 }
 0x11a   :  { %910 = vpow2.f32 %v589_v56  ;;  %v605_v54 = vmul.f32 1.442695, %v560_v43  ;;  %v565_v48 = vsub.f32 %v1592_v35, %v1664_v60  ;;  %v607_v0 = vmul.f32 1.442695, %v561_v17 }
 0x11b   :  { %912 = vpow2.f32 %v591_v55  ;;  %v566_v1 = vsub.f32 %v1595_v28, %v1667_v53  ;;  %v609_v62 = vmul.f32 1.442695, %v562_v39  ;;  %v567_v29 = vsub.f32 %v1602_v8, %v1658_v30 }
 0x11c   :  { %914 = vpow2.f32 %v593_v47  ;;  %v611_v5 = vmul.f32 1.442695, %v563_v50  ;;  %v568_v35 = vsub.f32 %v1605_v11, %v1661_v57  ;;  %v613_v40 = vmul.f32 1.442695, %v564_v16 }
 0x11d   :  { %916 = vpow2.f32 %v595_v24  ;;  %v569_v28 = vsub.f32 %v1608_v12, %v1664_v60  ;;  %v615_v7 = vmul.f32 1.442695, %v565_v48  ;;  %v570_v8 = vsub.f32 %v1611_v41, %v1667_v53 }
 0x11e   :  { %918 = vpow2.f32 %v597_v52  ;;  %v617_v36 = vmul.f32 1.442695, %v566_v1  ;;  %v571_v33 = vsub.f32 %v1620_v21, %v1658_v30  ;;  %v619_v14 = vmul.f32 1.442695, %v567_v29 }
 0x11f   :  { %v1705_v10 = vpop.eup %900  ;;  %920 = vpow2.f32 %v599_v13  ;;  %v572_v41 = vsub.f32 %v1623_v19, %v1661_v57  ;;  %v621_v23 = vmul.f32 1.442695, %v568_v35  ;;  %v573_v21 = vsub.f32 %v1626_v26, %v1664_v60 }
 0x120   :  { %v1709_v15 = vpop.eup %902  ;;  %922 = vpow2.f32 %v601_v49  ;;  %v623_v25 = vmul.f32 1.442695, %v569_v28  ;;  %v574_v19 = vsub.f32 %v1635_v51, %v1667_v53  ;;  %v625_v22 = vmul.f32 1.442695, %v570_v8 }
 0x121   :  { %v1713_v3 = vpop.eup %904  ;;  %924 = vpow2.f32 %v603_v9  ;;  %v575_v38 = vsub.f32 %v1642_v2, %v1658_v30  ;;  %v627_v26 = vmul.f32 1.442695, %v571_v33  ;;  %v576_v55 = vsub.f32 %v1645_v4, %v1661_v57 }
 0x122   :  { %v1717_v18 = vpop.eup %906  ;;  %926 = vpow2.f32 %v605_v54  ;;  %v629_v51 = vmul.f32 1.442695, %v572_v41  ;;  %v577_v46 = vsub.f32 %v1648_v6, %v1664_v60  ;;  %v631_v2 = vmul.f32 1.442695, %v573_v21 }
 0x123   :  { %v1721_v32 = vpop.eup %908  ;;  %928 = vpow2.f32 %v607_v0  ;;  %v578_v43 = vsub.f32 %v1654_v37, %v1667_v53  ;;  %v633_v4 = vmul.f32 1.442695, %v574_v19  ;;  %v635_v17 = vmul.f32 1.442695, %v575_v38 }
 0x124   :  { %v1725_v61 = vpop.eup %910  ;;  %930 = vpow2.f32 %v609_v62  ;;  %v643_v34 = vadd.f32 %v1721_v32, %v1705_v10  ;;  %v637_v60 = vmul.f32 1.442695, %v576_v55  ;;  %v639_v37 = vmul.f32 1.442695, %v577_v46 }
 0x125   :  { %v1731_v11 = vpop.eup %912  ;;  %932 = vpow2.f32 %v611_v5  ;;  %v650_v12 = vadd.f32 %v1725_v61, %v1709_v15  ;;  %v641_v9 = vmul.f32 1.442695, %v578_v43 }
 0x126   :  { %v1737_v63 = vpop.eup %914  ;;  %934 = vpow2.f32 %v613_v40  ;;  %v657_v20 = vadd.f32 %v1731_v11, %v1713_v3 }
 0x127   :  { %v1743_v59 = vpop.eup %916  ;;  %936 = vpow2.f32 %v615_v7  ;;  %v664_v27 = vadd.f32 %v1737_v63, %v1717_v18 }
 0x128   :  { %v1749_v44 = vpop.eup %918  ;;  %938 = vpow2.f32 %v617_v36  ;;  %v644_v42 = vadd.f32 %v1743_v59, %v643_v34 }
 0x129   :  { %v1754_v45 = vpop.eup %920  ;;  %940 = vpow2.f32 %v619_v14  ;;  %v651_v56 = vadd.f32 %v1749_v44, %v650_v12 }
 0x12a   :  { %v1759_v58 = vpop.eup %922  ;;  %942 = vpow2.f32 %v621_v23  ;;  %v658_v31 = vadd.f32 %v1754_v45, %v657_v20 }
 0x12b   :  { %v1764_v47 = vpop.eup %924  ;;  %944 = vpow2.f32 %v623_v25  ;;  %v665_v30 = vadd.f32 %v1759_v58, %v664_v27 }
 0x12c   :  { %v1769_v24 = vpop.eup %926  ;;  %946 = vpow2.f32 %v625_v22  ;;  %v645_v57 = vadd.f32 %v1764_v47, %v644_v42 }
 0x12d   :  { %v1774_v52 = vpop.eup %928  ;;  %948 = vpow2.f32 %v627_v26  ;;  %v652_v13 = vadd.f32 %v1769_v24, %v651_v56 }
 0x12e   :  { %v1777_v6 = vpop.eup %930  ;;  %950 = vpow2.f32 %v629_v51  ;;  %v659_v39 = vadd.f32 %v1774_v52, %v658_v31 }
 0x12f   :  { %v1780_v49 = vpop.eup %932  ;;  %952 = vpow2.f32 %v631_v2  ;;  %v666_v53 = vadd.f32 %v1777_v6, %v665_v30 }
 0x130   :  { %v935_v50 = vpop.eup %934  ;;  %954 = vpow2.f32 %v633_v4  ;;  %v646_v16 = vadd.f32 %v1780_v49, %v645_v57 }
 0x131   :  { %v937_v54 = vpop.eup %936  ;;  %956 = vpow2.f32 %v635_v17  ;;  %v653_v48 = vadd.f32 %v935_v50, %v652_v13 }
 0x132   :  { %v939_v0 = vpop.eup %938  ;;  %958 = vpow2.f32 %v637_v60  ;;  %v660_v1 = vadd.f32 %v937_v54, %v659_v39 }
 0x133   :  { %v941_v62 = vpop.eup %940  ;;  %960 = vpow2.f32 %v639_v37  ;;  %v667_v29 = vadd.f32 %v939_v0, %v666_v53 }
 0x134   :  { %v943_v5 = vpop.eup %942  ;;  %962 = vpow2.f32 %v641_v9  ;;  %v647_v35 = vadd.f32 %v941_v62, %v646_v16 }
 0x135   :  { %v945_v40 = vpop.eup %944  ;;  %v654_v28 = vadd.f32 %v943_v5, %v653_v48 }
 0x136   :  { %v947_v7 = vpop.eup %946  ;;  %v661_v8 = vadd.f32 %v945_v40, %v660_v1  ;;  %v979_v1 = vld [vmem:[#allocation2 + $0x18] sm:$0xff] }
 0x137   :  { %v949_v36 = vpop.eup %948  ;;  %v668_v34 = vadd.f32 %v947_v7, %v667_v29  ;;  %v980_v29 = vld [vmem:[#allocation2 + $0x20] sm:$0xff] }
 0x138   :  { %v951_v33 = vpop.eup %950  ;;  %v648_v14 = vadd.f32 %v949_v36, %v647_v35  ;;  %v981_v35 = vld [vmem:[#allocation2 + $0x28] sm:$0xff] }
 0x139   :  { %v953_v12 = vpop.eup %952  ;;  %v655_v41 = vadd.f32 %v951_v33, %v654_v28  ;;  %v982_v28 = vld [vmem:[#allocation2 + $0x30] sm:$0xff] }
 0x13a   :  { %v955_v23 = vpop.eup %954  ;;  %v662_v20 = vadd.f32 %v953_v12, %v661_v8  ;;  %v983_v8 = vld [vmem:[#allocation2 + $0x38] sm:$0xff] }
 0x13b   :  { %v957_v21 = vpop.eup %956  ;;  %v669_v25 = vadd.f32 %v955_v23, %v668_v34 }
 0x13c   :  { %v959_v27 = vpop.eup %958  ;;  %v649_v19 = vadd.f32 %v957_v21, %v648_v14 }
 0x13d   :  { %v961_v22 = vpop.eup %960  ;;  %v656_v42 = vadd.f32 %v959_v27, %v655_v41  ;;  %v984_v41 = vld [vmem:[#allocation2 + $0x40] sm:$0xff] }
 0x13e   :  { %v963_v38 = vpop.eup %962  ;;  %v663_v26 = vadd.f32 %v961_v22, %v662_v20  ;;  %964 = vrcp.f32 %v649_v19  ;;  %v985_v20 = vld [vmem:[#allocation2 + $0x48] sm:$0xff]  ;;  %v986_v19 = vld [vmem:[#allocation2 + $0x50] sm:$0xff] }
 0x13f   :  { %v670_v56 = vadd.f32 %v963_v38, %v669_v25  ;;  %966 = vrcp.f32 %v656_v42 }
 0x140   :  { %968 = vrcp.f32 %v663_v26  ;;  %v987_v26 = vld [vmem:[#allocation2 + $0x58] sm:$0xff] }
 0x141   :  { %970 = vrcp.f32 %v670_v56 }
 0x148   :  { %v965_v55 = vpop.eup %964 }
 0x149   :  { %v967_v51 = vpop.eup %966  ;;  %v675_v2 = vmul.f32 %v965_v55, %v1705_v10  ;;  %v679_v30 = vmul.f32 %v965_v55, %v1721_v32  ;;  %v683_v43 = vmul.f32 %v965_v55, %v1743_v59  ;;  %v687_v4 = vmul.f32 %v965_v55, %v1764_v47 }
 0x14a   :  { %v969_v31 = vpop.eup %968  ;;  %v676_v57 = vmul.f32 %v967_v51, %v1709_v15  ;;  %v680_v17 = vmul.f32 %v967_v51, %v1725_v61  ;;  %v684_v13 = vmul.f32 %v967_v51, %v1749_v44  ;;  %v688_v60 = vmul.f32 %v967_v51, %v1769_v24 }
 0x14b   :  { %v971_v46 = vpop.eup %970  ;;  %v677_v39 = vmul.f32 %v969_v31, %v1713_v3  ;;  %v681_v37 = vmul.f32 %v969_v31, %v1731_v11  ;;  %v685_v10 = vmul.f32 %v969_v31, %v1754_v45  ;;  %v689_v32 = vmul.f32 %v969_v31, %v1774_v52 }
 0x14c   :  { %v678_v59 = vmul.f32 %v971_v46, %v1717_v18  ;;  %v682_v47 = vmul.f32 %v971_v46, %v1737_v63  ;;  %v686_v15 = vmul.f32 %v971_v46, %v1759_v58  ;;  %v690_v61 = vmul.f32 %v971_v46, %v1777_v6  ;;  %v976_v6 = vld [vmem:[#allocation2] sm:$0xff] }
 0x14d   :  { %v691_v44 = vmul.f32 %v965_v55, %v1780_v49  ;;  %v692_v53 = vmul.f32 %v967_v51, %v935_v50  ;;  %v693_v24 = vmul.f32 %v969_v31, %v937_v54  ;;  %v694_v9 = vmul.f32 %v971_v46, %v939_v0  ;;  %v977_v49 = vld [vmem:[#allocation2 + $0x8] sm:$0xff]  ;;  %v978_v54 = vld [vmem:[#allocation2 + $0x10] sm:$0xff] }
 0x14e   :  { %v695_v3 = vmul.f32 %v965_v55, %v941_v62  ;;  %v696_v16 = vmul.f32 %v967_v51, %v943_v5  ;;  %v1801_v11 = vmul.f32 %v969_v31, %v945_v40  ;;  %v1803_v45 = vmul.f32 %v971_v46, %v947_v7 }
 0x14f   :  { %v1805_v52 = vmul.f32 %v965_v55, %v949_v36  ;;  %v1807_v18 = vmul.f32 %v967_v51, %v951_v33  ;;  %v1809_v63 = vmul.f32 %v969_v31, %v953_v12  ;;  %v1811_v58 = vmul.f32 %v971_v46, %v955_v23 }
 0x150   :  { %v707_v48 = vmul.f32 %v976_v6, %v675_v2  ;;  %v708_v50 = vmul.f32 %v977_v49, %v676_v57  ;;  %v709_v0 = vmul.f32 %v978_v54, %v677_v39  ;;  %v710_v62 = vmul.f32 %v979_v1, %v678_v59  ;;  %v988_v2 = vld [vmem:[#allocation2 + $0x60] sm:$0xff]  ;;  %v989_v57 = vld [vmem:[#allocation2 + $0x68] sm:$0xff]  ;;  %v990_v39 = vld [vmem:[#allocation2 + $0x70] sm:$0xff] }
 0x151   :  { %v711_v5 = vmul.f32 %v980_v29, %v679_v30  ;;  %v712_v40 = vmul.f32 %v981_v35, %v680_v17  ;;  %v713_v7 = vmul.f32 %v982_v28, %v681_v37  ;;  %v714_v36 = vmul.f32 %v983_v8, %v682_v47  ;;  %v994_v59 = vld [vmem:[#allocation2 + $0x90] sm:$0xff]  ;;  %v995_v47 = vld [vmem:[#allocation2 + $0x98] sm:$0xff]  ;;  %v996_v54 = vld [vmem:[#allocation2 + $0xa0] sm:$0xff] }
 0x152   :  { %v703_v34 = vmul.f32 %v965_v55, %v957_v21  ;;  %v704_v33 = vmul.f32 %v967_v51, %v959_v27  ;;  %v1813_v14 = vmul.f32 %v969_v31, %v961_v22  ;;  %v1815_v12 = vmul.f32 %v971_v46, %v963_v38  ;;  %v991_v21 = vld [vmem:[#allocation2 + $0x78] sm:$0xff]  ;;  %v992_v31 = vld [vmem:[#allocation2 + $0x80] sm:$0xff]  ;;  %v997_v1 = vld [vmem:[#allocation2 + $0xa8] sm:$0xff] }
 0x153   :  { %v715_v23 = vmul.f32 %v984_v41, %v683_v43  ;;  %v716_v25 = vmul.f32 %v985_v20, %v684_v13  ;;  %v717_v42 = vmul.f32 %v986_v19, %v685_v10  ;;  %v718_v56 = vmul.f32 %v987_v26, %v686_v15  ;;  %v993_v43 = vld [vmem:[#allocation2 + $0x88] sm:$0xff]  ;;  %v1002_v28 = vld [vmem:[#allocation2 + $0xd0] sm:$0xff]  ;;  %v1004_v41 = vld [vmem:[#allocation2 + $0xe0] sm:$0xff] }
 0x154   :  { %v719_v30 = vmul.f32 %v988_v2, %v687_v4  ;;  %v720_v17 = vmul.f32 %v989_v57, %v688_v60  ;;  %v721_v37 = vmul.f32 %v990_v39, %v689_v32  ;;  %v722_v27 = vmul.f32 %v991_v21, %v690_v61  ;;  %v1001_v35 = vld [vmem:[#allocation2 + $0xc8] sm:$0xff]  ;;  %v1006_v19 = vld [vmem:[#allocation2 + $0xf0] sm:$0xff] }
 0x155   :  { %v739_v22 = vadd.f32 %v711_v5, %v707_v48  ;;  %v746_v55 = vadd.f32 %v712_v40, %v708_v50  ;;  %v753_v38 = vadd.f32 %v713_v7, %v709_v0  ;;  %v760_v51 = vadd.f32 %v714_v36, %v710_v62  ;;  %v998_v48 = vld [vmem:[#allocation2 + $0xb0] sm:$0xff]  ;;  %v999_v0 = vld [vmem:[#allocation2 + $0xb8] sm:$0xff]  ;;  %v1000_v5 = vld [vmem:[#allocation2 + $0xc0] sm:$0xff] }
 0x156   :  { %v723_v46 = vmul.f32 %v992_v31, %v691_v44  ;;  %v724_v13 = vmul.f32 %v993_v43, %v692_v53  ;;  %v725_v10 = vmul.f32 %v994_v59, %v693_v24  ;;  %v726_v15 = vmul.f32 %v995_v47, %v694_v9  ;;  %v1005_v20 = vld [vmem:[#allocation2 + $0xe8] sm:$0xff] }
 0x157   :  { %v740_v6 = vadd.f32 %v739_v22, %v715_v23  ;;  %v747_v4 = vadd.f32 %v746_v55, %v716_v25  ;;  %v754_v49 = vadd.f32 %v753_v38, %v717_v42  ;;  %v761_v60 = vadd.f32 %v760_v51, %v718_v56  ;;  %v1007_v42 = vld [vmem:[#allocation2 + $0xf8] sm:$0xff] }
 0x158   :  { %v727_v32 = vmul.f32 %v996_v54, %v695_v3  ;;  %v728_v61 = vmul.f32 %v997_v1, %v696_v16  ;;  %v729_v50 = vmul.f32 %v998_v48, %v1801_v11  ;;  %v730_v44 = vmul.f32 %v999_v0, %v1803_v45  ;;  %v1003_v16 = vld [vmem:[#allocation2 + $0xd8] sm:$0xff] }
 0x159   :  { %v741_v62 = vadd.f32 %v740_v6, %v719_v30  ;;  %v748_v53 = vadd.f32 %v747_v4, %v720_v17  ;;  %v755_v29 = vadd.f32 %v754_v49, %v721_v37  ;;  %v762_v24 = vadd.f32 %v761_v60, %v722_v27 }
 0x15a   :  { %v731_v9 = vmul.f32 %v1000_v5, %v1805_v52  ;;  %v732_v40 = vmul.f32 %v1001_v35, %v1807_v18  ;;  %v733_v3 = vmul.f32 %v1002_v28, %v1809_v63  ;;  %v734_v7 = vmul.f32 %v1003_v16, %v1811_v58 }
 0x15b   :  { %v742_v11 = vadd.f32 %v741_v62, %v723_v46  ;;  %v749_v8 = vadd.f32 %v748_v53, %v724_v13  ;;  %v756_v36 = vadd.f32 %v755_v29, %v725_v10  ;;  %v763_v45 = vadd.f32 %v762_v24, %v726_v15 }
 0x15c   :  { %v735_v23 = vmul.f32 %v1004_v41, %v703_v34  ;;  %v736_v25 = vmul.f32 %v1005_v20, %v704_v33  ;;  %v737_v52 = vmul.f32 %v1006_v19, %v1813_v14  ;;  %v738_v18 = vmul.f32 %v1007_v42, %v1815_v12 }
 0x15d   :  { %v743_v26 = vadd.f32 %v742_v11, %v727_v32  ;;  %v750_v56 = vadd.f32 %v749_v8, %v728_v61  ;;  %v757_v63 = vadd.f32 %v756_v36, %v729_v50  ;;  %v764_v2 = vadd.f32 %v763_v45, %v730_v44 }
 0x15f   :  { %v744_v30 = vadd.f32 %v743_v26, %v731_v9  ;;  %v751_v58 = vadd.f32 %v750_v56, %v732_v40  ;;  %v758_v57 = vadd.f32 %v757_v63, %v733_v3  ;;  %v765_v17 = vadd.f32 %v764_v2, %v734_v7 }
 0x161   :  { %v745_v39 = vadd.f32 %v744_v30, %v735_v23  ;;  %v752_v37 = vadd.f32 %v751_v58, %v736_v25  ;;  %v759_v21 = vadd.f32 %v758_v57, %v737_v52  ;;  %v766_v34 = vadd.f32 %v765_v17, %v738_v18 }
 0x163   :  { %v767_v27 = vmul.f32 %v745_v39, %v745_v39  ;;  %v768_v33 = vmul.f32 %v752_v37, %v752_v37  ;;  %v769_v22 = vmul.f32 %v759_v21, %v759_v21  ;;  %v770_v55 = vmul.f32 %v766_v34, %v766_v34 }
 0x165   :  { %v771_v14 = vadd.f32 %v768_v33, %v767_v27 }
 0x167   :  { %v772_v38 = vadd.f32 %v771_v14, %v769_v22 }
 0x169   :  { %v773_v51 = vadd.f32 %v772_v38, %v770_v55 }
 0x16b   :  { %v774_v12 = vrot.slane %v773_v51, 4 }
 0x16d   :  { %v775_v31 = vadd.f32 %v774_v12, %v773_v51 }
 0x16f   :  { %v776_v46 = vrot.slane %v775_v31, 2 }
 0x171   :  { %v777_v43 = vadd.f32 %v776_v46, %v775_v31 }
 0x173   :  { %v778_v13 = vrot.slane %v777_v43, 1 }
 0x175   :  { %v779_v59 = vadd.f32 %v778_v13, %v777_v43 }
 0x177   :  { %972 = vrsqrt.f32 %v779_v59  ;;  %vm782_vm4 = vcmp.eq.f32.partialorder %v779_v59, inf  ;;  %v785_v47 = vand.u32 2147483648, %v779_v59  ;;  %vm784_vm5 = vcmp.eq.f32.partialorder %v779_v59, 0.0 }
 0x181   :  { %v973_v10 = vpop.eup %972 }
 0x182   :  { %v781_v15 = vmul.f32 %v973_v10, %v779_v59 }
 0x184   :  { %v783_v6 = vsel %vm782_vm4, %v779_v59, %v781_v15 }
 0x185   :  { %v786_v4 = vsel %vm784_vm5, %v785_v47, %v783_v6 }
 0x186   :  { %v787_v49 = vadd.f32 1.0, %v786_v4 }
 0x188   :  { %v788_v60 = vmul.f32 %v787_v49, %v786_v4 }
 0x18a   :  { %974 = vrcp.f32 %v788_v60 }
 0x194   :  { %v975_v54 = vpop.eup %974 }
 0x195   :  { %v790_v32 = vmul.f32 %v975_v54, %v779_v59 }
 0x197   :  { %v791_v1 = vmul.f32 %v790_v32, %v745_v39  ;;  %v792_v61 = vmul.f32 %v790_v32, %v752_v37  ;;  %v793_v48 = vmul.f32 %v790_v32, %v759_v21  ;;  %v794_v50 = vmul.f32 %v790_v32, %v766_v34 }
 0x199   :  { %795 = vst [vmem:[#allocation5] sm:$0xff] %v791_v1  ;;  %796 = vst [vmem:[#allocation5 + $0x8] sm:$0xff] %v792_v61 }
 0x19a   :  { %797 = vst [vmem:[#allocation5 + $0x10] sm:$0xff] %v793_v48  ;;  %798 = vst [vmem:[#allocation5 + $0x18] sm:$0xff] %v794_v50 }
 0x19b   :  { %1041 = shalt.err (!%p1038_p12)
}
 0x19c   :  { %s1042_s24 = scalar_lea.hbm %s1841_s1, 512 }
 0x19d   :  { %p1043_p13 = scmp.ne.s32.totalorder %s1841_s1, %s1042_s24  ;;  %p1046_p0 = scmp.lt.u32.totalorder %s1042_s24, %s1841_s1 }
 0x19f   :  { %p1048_p1 = pnand %p1046_p0, %p1043_p13 }
 0x1a1   :  { %1051 = shalt.err (!%p1048_p1)
}
 0x1a2   :  { %810 = dma.vmem_to_hbm [thread:$0]  %s805_s20, 512, %s1841_s1, [#allocation4], %s1057_s16, %s1057_s16, %s1058_s17  }
 0x1a3   :  { %1054 = dma.done.wait [#allocation4], 512  }
 0x1a4   :  { %1055 = vsyncadd [#allocation4], 4294966784 }
 0x1a5   :  { %814 = vsyncpa [#allocation3], 1 }
 0x1a6   :  { %815 = vsyncpa [#allocation4], 1 }

</bundles_post_ra>
